<compile_context>
chip_gen: v7x
topology: tpu7x:2x2x1
jax: 0.10.0
libtpu: 0.0.40
codegen_flags: <defaults>
</compile_context>

<pallas_src>
import math
import jax
import jax.numpy as jnp
from jax.experimental import pallas as pl
from jax.experimental.pallas import tpu as pltpu


# ---------------- model hyper-parameters (deterministic, in-script) ----------------
DT = 0.001
TAU_M = 10.0 * DT          # membrane time constant of LIF layer
TAU_OUT = 10.0 * DT        # time constant of readout integrator
ALPHA = math.exp(-DT / TAU_M)
KAPPA = math.exp(-DT / TAU_OUT)
THRESHOLD = 1.0

INPUT_SIZE = 32
HIDDEN_SIZE = 32
OUTPUT_SIZE = 16
INT_TIME_STEPS = 8
BATCH = 8


# ------------------------------- Pallas kernel -------------------------------------
def _make_snn_kernel(T, B, F, H, O):
    """Build a single-invocation SNN kernel closed over the static shapes."""

    def kernel(x_ref, w_in_ref, w_rec_ref, w_out_ref, b_out_ref,
               out_ref, vhid_ref, zhid_ref):
        # x_ref      : (T*B, F)  time-major flattened inputs (rows t*B .. (t+1)*B-1 = step t)
        # out_ref    : (B, T*O)  readout trace, lane-dense
        # vhid_ref   : (B, T*H)  LIF membrane trace, lane-dense
        # zhid_ref   : (B, T*H)  spike trace, lane-dense

        # --- hoisted: input currents for ALL time steps in one MXU call (no state dep) ---
        i_in_all = jnp.dot(x_ref[...], w_in_ref[...],
                           preferred_element_type=jnp.float32)        # (T*B, H)

        # --- hoisted loop-invariant loads ---
        w_rec = w_rec_ref[...]                                          # (H, H)
        w_out = w_out_ref[...]                                          # (H, O)
        b_out = b_out_ref[...]                                          # (1, O)

        # --- serial LIF recurrence (only z @ W_rec + VPU ops stay on the critical chain) ---
        v = jnp.zeros((B, H), jnp.float32)
        z = jnp.zeros((B, H), jnp.float32)
        z_steps = []
        for t in range(T):                                              # T static -> unrolled
            i_rec = jnp.dot(z, w_rec, preferred_element_type=jnp.float32)
            v = ALPHA * v * (1.0 - z) + i_in_all[t * B:(t + 1) * B, :] + i_rec
            # TODO(synk): heaviside surrogate may fire at V == threshold; strict '>' kept here.
            z = (v > THRESHOLD).astype(jnp.float32)
            vhid_ref[:, t * H:(t + 1) * H] = v                          # static-slice VMEM store
            zhid_ref[:, t * H:(t + 1) * H] = z
            z_steps.append(z)

        # --- readout leaky integrator, off the serial chain: one matmul + cheap scan ---
        z_all = jnp.concatenate(z_steps, axis=0)                        # (T*B, H)
        proj = jnp.dot(z_all, w_out, preferred_element_type=jnp.float32)  # (T*B, O)
        o = jnp.zeros((B, O), jnp.float32)
        for t in range(T):
            o = KAPPA * o + proj[t * B:(t + 1) * B, :] + b_out
            out_ref[:, t * O:(t + 1) * O] = o

    return kernel


def snn_forward(inputs, params, *, int_time_steps=INT_TIME_STEPS):
    """JAX wrapper reproducing SNN.forward().

    inputs: (batch, features) or (batch, time, features), float32.
    Returns (outputs_trace (B, T, O), hidden_states dict).
    """
    w_in, w_rec, w_out, b_out = params
    inputs = jnp.asarray(inputs, jnp.float32)

    # ---- _format_inputs ----
    if inputs.ndim == 2:
        inputs = jnp.repeat(inputs[:, None, :], int_time_steps, axis=1)
    assert inputs.ndim == 3
    b, t_in, f = inputs.shape
    t_diff = int_time_steps - t_in
    assert t_diff >= 0
    if t_diff > 0:
        inputs = jnp.concatenate(
            [inputs, jnp.zeros((b, t_diff, f), jnp.float32)], axis=1)

    T = int_time_steps
    B, F = inputs.shape[0], inputs.shape[2]
    H = w_in.shape[1]
    O = w_out.shape[1]

    # time-major flattened for the kernel: rows [t*B, (t+1)*B) hold x_t  -> (T*B, F)
    x_flat = jnp.transpose(inputs, (1, 0, 2)).reshape(T * B, F)
    b_out_2d = b_out.reshape(1, O)

    kernel = _make_snn_kernel(T, B, F, H, O)
    vmem_spec = pl.BlockSpec(memory_space=pltpu.MemorySpace.VMEM)

    out2d, vhid2d, zhid2d = pl.pallas_call(
        kernel,
        out_shape=(
            jax.ShapeDtypeStruct((B, T * O), jnp.float32),   # readout trace (lane-dense)
            jax.ShapeDtypeStruct((B, T * H), jnp.float32),   # hidden V trace (lane-dense)
            jax.ShapeDtypeStruct((B, T * H), jnp.float32),   # hidden Z trace (lane-dense)
        ),
        in_specs=[vmem_spec] * 5,
        out_specs=[vmem_spec] * 3,
    )(x_flat, w_in, w_rec, w_out, b_out_2d)

    outputs_trace = out2d.reshape(B, T, O)
    v_hid_trace = vhid2d.reshape(B, T, H)
    z_hid_trace = zhid2d.reshape(B, T, H)

    hidden_states = {
        "input": (v_hid_trace, z_hid_trace),
        "readout": (outputs_trace,),
    }
    return outputs_trace, hidden_states


def get_prediction_logits(inputs, params):
    outputs_trace, hidden_states = snn_forward(inputs, params)
    logits = jnp.max(outputs_trace, axis=1)   # torch.max(outputs_trace, dim=1).values
    return logits, outputs_trace, hidden_states


def init_params(key):
    """Deterministic normal init of all weights (stand-in for initialize_weights_)."""
    k1, k2, k3, k4 = jax.random.split(key, 4)
    w_in = jax.random.normal(k1, (INPUT_SIZE, HIDDEN_SIZE), jnp.float32) / math.sqrt(INPUT_SIZE)
    w_rec = jax.random.normal(k2, (HIDDEN_SIZE, HIDDEN_SIZE), jnp.float32) / math.sqrt(HIDDEN_SIZE)
    w_out = jax.random.normal(k3, (HIDDEN_SIZE, OUTPUT_SIZE), jnp.float32) / math.sqrt(HIDDEN_SIZE)
    b_out = jax.random.normal(k4, (OUTPUT_SIZE,), jnp.float32)
    return w_in, w_rec, w_out, b_out


if __name__ == "__main__":
    key = jax.random.PRNGKey(0)
    pkey, xkey = jax.random.split(key)
    params = init_params(pkey)

    # (batch, features) input -> repeated over int_time_steps, as in _format_inputs
    x = jax.random.normal(xkey, (BATCH, INPUT_SIZE), jnp.float32)

    logits, outputs_trace, hidden_states = get_prediction_logits(x, params)
    jax.block_until_ready((logits, outputs_trace, hidden_states))

    assert outputs_trace.shape == (BATCH, INT_TIME_STEPS, OUTPUT_SIZE)
    assert logits.shape == (BATCH, OUTPUT_SIZE)
    assert hidden_states["input"][0].shape == (BATCH, INT_TIME_STEPS, HIDDEN_SIZE)
    assert hidden_states["input"][1].shape == (BATCH, INT_TIME_STEPS, HIDDEN_SIZE)
    assert hidden_states["readout"][0].shape == (BATCH, INT_TIME_STEPS, OUTPUT_SIZE)

    print("KERNEL_OK")
</pallas_src>

<mosaic_0001>
module attributes {stable_mosaic.version = 11 : i64} {
  func.func @kernel(%arg0: memref<64x32xf32, #tpu.memory_space<vmem>>, %arg1: memref<32x32xf32, #tpu.memory_space<vmem>>, %arg2: memref<32x32xf32, #tpu.memory_space<vmem>>, %arg3: memref<32x16xf32, #tpu.memory_space<vmem>>, %arg4: memref<1x16xf32, #tpu.memory_space<vmem>>, %arg5: memref<8x128xf32, #tpu.memory_space<vmem>>, %arg6: memref<8x256xf32, #tpu.memory_space<vmem>>, %arg7: memref<8x256xf32, #tpu.memory_space<vmem>>) attributes {dimension_semantics = [], scalar_prefetch = 0 : i64, scratch_operands = 0 : i64, tpu.core_type = #tpu.core_type<tc>} {
    %c0 = arith.constant 0 : index
    %c0_0 = arith.constant 0 : index
    %0 = vector.load %arg0[%c0, %c0_0] : memref<64x32xf32, #tpu.memory_space<vmem>>, vector<64x32xf32>
    %c0_1 = arith.constant 0 : index
    %c0_2 = arith.constant 0 : index
    %1 = vector.load %arg1[%c0_1, %c0_2] : memref<32x32xf32, #tpu.memory_space<vmem>>, vector<32x32xf32>
    %cst = arith.constant dense<0.000000e+00> : vector<64x32xf32>
    %2 = tpu.matmul %0, %1, %cst {dimension_numbers = #tpu.dot_dimension_numbers<[1], [0], [0], [1], [0, 0, 1, 1], [], []>} : vector<64x32xf32>, vector<32x32xf32>, vector<64x32xf32> -> vector<64x32xf32>
    %c0_3 = arith.constant 0 : index
    %c0_4 = arith.constant 0 : index
    %3 = vector.load %arg2[%c0_3, %c0_4] : memref<32x32xf32, #tpu.memory_space<vmem>>, vector<32x32xf32>
    %c0_5 = arith.constant 0 : index
    %c0_6 = arith.constant 0 : index
    %4 = vector.load %arg3[%c0_5, %c0_6] : memref<32x16xf32, #tpu.memory_space<vmem>>, vector<32x16xf32>
    %c0_7 = arith.constant 0 : index
    %c0_8 = arith.constant 0 : index
    %5 = vector.load %arg4[%c0_7, %c0_8] : memref<1x16xf32, #tpu.memory_space<vmem>>, vector<1x16xf32>
    %cst_9 = arith.constant 0.000000e+00 : f32
    %6 = vector.broadcast %cst_9 : f32 to vector<8x32xf32>
    %cst_10 = arith.constant 0.000000e+00 : f32
    %7 = vector.broadcast %cst_10 : f32 to vector<8x32xf32>
    %cst_11 = arith.constant dense<0.000000e+00> : vector<8x32xf32>
    %8 = tpu.matmul %7, %3, %cst_11 {dimension_numbers = #tpu.dot_dimension_numbers<[1], [0], [0], [1], [0, 0, 1, 1], [], []>} : vector<8x32xf32>, vector<32x32xf32>, vector<8x32xf32> -> vector<8x32xf32>
    %cst_12 = arith.constant 0.904837429 : f32
    %9 = vector.broadcast %cst_12 : f32 to vector<8x32xf32>
    %10 = arith.mulf %9, %6 : vector<8x32xf32>
    %cst_13 = arith.constant 1.000000e+00 : f32
    %11 = vector.broadcast %cst_13 : f32 to vector<8x32xf32>
    %12 = arith.subf %11, %7 : vector<8x32xf32>
    %13 = arith.mulf %10, %12 : vector<8x32xf32>
    %14 = vector.extract_strided_slice %2 {offsets = [0, 0], sizes = [8, 32], strides = [1, 1]} : vector<64x32xf32> to vector<8x32xf32>
    %15 = arith.addf %13, %14 : vector<8x32xf32>
    %16 = arith.addf %15, %8 : vector<8x32xf32>
    %cst_14 = arith.constant 1.000000e+00 : f32
    %17 = vector.broadcast %cst_14 : f32 to vector<8x32xf32>
    %18 = arith.cmpf ogt, %16, %17 : vector<8x32xf32>
    %19 = arith.extui %18 : vector<8x32xi1> to vector<8x32xi32>
    %20 = arith.sitofp %19 : vector<8x32xi32> to vector<8x32xf32>
    %c0_15 = arith.constant 0 : index
    %c0_16 = arith.constant 0 : index
    %21 = vector.load %arg6[%c0_15, %c0_16] : memref<8x256xf32, #tpu.memory_space<vmem>>, vector<8x32xf32>
    tpu.vector_store %arg6[%c0_15, %c0_16], %16 {strides = array<i32>} : memref<8x256xf32, #tpu.memory_space<vmem>>, vector<8x32xf32>,
    %c0_17 = arith.constant 0 : index
    %c0_18 = arith.constant 0 : index
    %22 = vector.load %arg7[%c0_17, %c0_18] : memref<8x256xf32, #tpu.memory_space<vmem>>, vector<8x32xf32>
    tpu.vector_store %arg7[%c0_17, %c0_18], %20 {strides = array<i32>} : memref<8x256xf32, #tpu.memory_space<vmem>>, vector<8x32xf32>,
    %cst_19 = arith.constant dense<0.000000e+00> : vector<8x32xf32>
    %23 = tpu.matmul %20, %3, %cst_19 {dimension_numbers = #tpu.dot_dimension_numbers<[1], [0], [0], [1], [0, 0, 1, 1], [], []>} : vector<8x32xf32>, vector<32x32xf32>, vector<8x32xf32> -> vector<8x32xf32>
    %cst_20 = arith.constant 0.904837429 : f32
    %24 = vector.broadcast %cst_20 : f32 to vector<8x32xf32>
    %25 = arith.mulf %24, %16 : vector<8x32xf32>
    %cst_21 = arith.constant 1.000000e+00 : f32
    %26 = vector.broadcast %cst_21 : f32 to vector<8x32xf32>
    %27 = arith.subf %26, %20 : vector<8x32xf32>
    %28 = arith.mulf %25, %27 : vector<8x32xf32>
    %29 = vector.extract_strided_slice %2 {offsets = [8, 0], sizes = [8, 32], strides = [1, 1]} : vector<64x32xf32> to vector<8x32xf32>
    %30 = arith.addf %28, %29 : vector<8x32xf32>
    %31 = arith.addf %30, %23 : vector<8x32xf32>
    %cst_22 = arith.constant 1.000000e+00 : f32
    %32 = vector.broadcast %cst_22 : f32 to vector<8x32xf32>
    %33 = arith.cmpf ogt, %31, %32 : vector<8x32xf32>
    %34 = arith.extui %33 : vector<8x32xi1> to vector<8x32xi32>
    %35 = arith.sitofp %34 : vector<8x32xi32> to vector<8x32xf32>
    %c0_23 = arith.constant 0 : index
    %c32 = arith.constant 32 : index
    %36 = vector.load %arg6[%c0_23, %c32] : memref<8x256xf32, #tpu.memory_space<vmem>>, vector<8x32xf32>
    tpu.vector_store %arg6[%c0_23, %c32], %31 {strides = array<i32>} : memref<8x256xf32, #tpu.memory_space<vmem>>, vector<8x32xf32>,
    %c0_24 = arith.constant 0 : index
    %c32_25 = arith.constant 32 : index
    %37 = vector.load %arg7[%c0_24, %c32_25] : memref<8x256xf32, #tpu.memory_space<vmem>>, vector<8x32xf32>
    tpu.vector_store %arg7[%c0_24, %c32_25], %35 {strides = array<i32>} : memref<8x256xf32, #tpu.memory_space<vmem>>, vector<8x32xf32>,
    %cst_26 = arith.constant dense<0.000000e+00> : vector<8x32xf32>
    %38 = tpu.matmul %35, %3, %cst_26 {dimension_numbers = #tpu.dot_dimension_numbers<[1], [0], [0], [1], [0, 0, 1, 1], [], []>} : vector<8x32xf32>, vector<32x32xf32>, vector<8x32xf32> -> vector<8x32xf32>
    %cst_27 = arith.constant 0.904837429 : f32
    %39 = vector.broadcast %cst_27 : f32 to vector<8x32xf32>
    %40 = arith.mulf %39, %31 : vector<8x32xf32>
    %cst_28 = arith.constant 1.000000e+00 : f32
    %41 = vector.broadcast %cst_28 : f32 to vector<8x32xf32>
    %42 = arith.subf %41, %35 : vector<8x32xf32>
    %43 = arith.mulf %40, %42 : vector<8x32xf32>
    %44 = vector.extract_strided_slice %2 {offsets = [16, 0], sizes = [8, 32], strides = [1, 1]} : vector<64x32xf32> to vector<8x32xf32>
    %45 = arith.addf %43, %44 : vector<8x32xf32>
    %46 = arith.addf %45, %38 : vector<8x32xf32>
    %cst_29 = arith.constant 1.000000e+00 : f32
    %47 = vector.broadcast %cst_29 : f32 to vector<8x32xf32>
    %48 = arith.cmpf ogt, %46, %47 : vector<8x32xf32>
    %49 = arith.extui %48 : vector<8x32xi1> to vector<8x32xi32>
    %50 = arith.sitofp %49 : vector<8x32xi32> to vector<8x32xf32>
    %c0_30 = arith.constant 0 : index
    %c64 = arith.constant 64 : index
    %51 = vector.load %arg6[%c0_30, %c64] : memref<8x256xf32, #tpu.memory_space<vmem>>, vector<8x32xf32>
    tpu.vector_store %arg6[%c0_30, %c64], %46 {strides = array<i32>} : memref<8x256xf32, #tpu.memory_space<vmem>>, vector<8x32xf32>,
    %c0_31 = arith.constant 0 : index
    %c64_32 = arith.constant 64 : index
    %52 = vector.load %arg7[%c0_31, %c64_32] : memref<8x256xf32, #tpu.memory_space<vmem>>, vector<8x32xf32>
    tpu.vector_store %arg7[%c0_31, %c64_32], %50 {strides = array<i32>} : memref<8x256xf32, #tpu.memory_space<vmem>>, vector<8x32xf32>,
    %cst_33 = arith.constant dense<0.000000e+00> : vector<8x32xf32>
    %53 = tpu.matmul %50, %3, %cst_33 {dimension_numbers = #tpu.dot_dimension_numbers<[1], [0], [0], [1], [0, 0, 1, 1], [], []>} : vector<8x32xf32>, vector<32x32xf32>, vector<8x32xf32> -> vector<8x32xf32>
    %cst_34 = arith.constant 0.904837429 : f32
    %54 = vector.broadcast %cst_34 : f32 to vector<8x32xf32>
    %55 = arith.mulf %54, %46 : vector<8x32xf32>
    %cst_35 = arith.constant 1.000000e+00 : f32
    %56 = vector.broadcast %cst_35 : f32 to vector<8x32xf32>
    %57 = arith.subf %56, %50 : vector<8x32xf32>
    %58 = arith.mulf %55, %57 : vector<8x32xf32>
    %59 = vector.extract_strided_slice %2 {offsets = [24, 0], sizes = [8, 32], strides = [1, 1]} : vector<64x32xf32> to vector<8x32xf32>
    %60 = arith.addf %58, %59 : vector<8x32xf32>
    %61 = arith.addf %60, %53 : vector<8x32xf32>
    %cst_36 = arith.constant 1.000000e+00 : f32
    %62 = vector.broadcast %cst_36 : f32 to vector<8x32xf32>
    %63 = arith.cmpf ogt, %61, %62 : vector<8x32xf32>
    %64 = arith.extui %63 : vector<8x32xi1> to vector<8x32xi32>
    %65 = arith.sitofp %64 : vector<8x32xi32> to vector<8x32xf32>
    %c0_37 = arith.constant 0 : index
    %c96 = arith.constant 96 : index
    %66 = vector.load %arg6[%c0_37, %c96] : memref<8x256xf32, #tpu.memory_space<vmem>>, vector<8x32xf32>
    tpu.vector_store %arg6[%c0_37, %c96], %61 {strides = array<i32>} : memref<8x256xf32, #tpu.memory_space<vmem>>, vector<8x32xf32>,
    %c0_38 = arith.constant 0 : index
    %c96_39 = arith.constant 96 : index
    %67 = vector.load %arg7[%c0_38, %c96_39] : memref<8x256xf32, #tpu.memory_space<vmem>>, vector<8x32xf32>
    tpu.vector_store %arg7[%c0_38, %c96_39], %65 {strides = array<i32>} : memref<8x256xf32, #tpu.memory_space<vmem>>, vector<8x32xf32>,
    %cst_40 = arith.constant dense<0.000000e+00> : vector<8x32xf32>
    %68 = tpu.matmul %65, %3, %cst_40 {dimension_numbers = #tpu.dot_dimension_numbers<[1], [0], [0], [1], [0, 0, 1, 1], [], []>} : vector<8x32xf32>, vector<32x32xf32>, vector<8x32xf32> -> vector<8x32xf32>
    %cst_41 = arith.constant 0.904837429 : f32
    %69 = vector.broadcast %cst_41 : f32 to vector<8x32xf32>
    %70 = arith.mulf %69, %61 : vector<8x32xf32>
    %cst_42 = arith.constant 1.000000e+00 : f32
    %71 = vector.broadcast %cst_42 : f32 to vector<8x32xf32>
    %72 = arith.subf %71, %65 : vector<8x32xf32>
    %73 = arith.mulf %70, %72 : vector<8x32xf32>
    %74 = vector.extract_strided_slice %2 {offsets = [32, 0], sizes = [8, 32], strides = [1, 1]} : vector<64x32xf32> to vector<8x32xf32>
    %75 = arith.addf %73, %74 : vector<8x32xf32>
    %76 = arith.addf %75, %68 : vector<8x32xf32>
    %cst_43 = arith.constant 1.000000e+00 : f32
    %77 = vector.broadcast %cst_43 : f32 to vector<8x32xf32>
    %78 = arith.cmpf ogt, %76, %77 : vector<8x32xf32>
    %79 = arith.extui %78 : vector<8x32xi1> to vector<8x32xi32>
    %80 = arith.sitofp %79 : vector<8x32xi32> to vector<8x32xf32>
    %c0_44 = arith.constant 0 : index
    %c128 = arith.constant 128 : index
    %81 = vector.load %arg6[%c0_44, %c128] : memref<8x256xf32, #tpu.memory_space<vmem>>, vector<8x32xf32>
    tpu.vector_store %arg6[%c0_44, %c128], %76 {strides = array<i32>} : memref<8x256xf32, #tpu.memory_space<vmem>>, vector<8x32xf32>,
    %c0_45 = arith.constant 0 : index
    %c128_46 = arith.constant 128 : index
    %82 = vector.load %arg7[%c0_45, %c128_46] : memref<8x256xf32, #tpu.memory_space<vmem>>, vector<8x32xf32>
    tpu.vector_store %arg7[%c0_45, %c128_46], %80 {strides = array<i32>} : memref<8x256xf32, #tpu.memory_space<vmem>>, vector<8x32xf32>,
    %cst_47 = arith.constant dense<0.000000e+00> : vector<8x32xf32>
    %83 = tpu.matmul %80, %3, %cst_47 {dimension_numbers = #tpu.dot_dimension_numbers<[1], [0], [0], [1], [0, 0, 1, 1], [], []>} : vector<8x32xf32>, vector<32x32xf32>, vector<8x32xf32> -> vector<8x32xf32>
    %cst_48 = arith.constant 0.904837429 : f32
    %84 = vector.broadcast %cst_48 : f32 to vector<8x32xf32>
    %85 = arith.mulf %84, %76 : vector<8x32xf32>
    %cst_49 = arith.constant 1.000000e+00 : f32
    %86 = vector.broadcast %cst_49 : f32 to vector<8x32xf32>
    %87 = arith.subf %86, %80 : vector<8x32xf32>
    %88 = arith.mulf %85, %87 : vector<8x32xf32>
    %89 = vector.extract_strided_slice %2 {offsets = [40, 0], sizes = [8, 32], strides = [1, 1]} : vector<64x32xf32> to vector<8x32xf32>
    %90 = arith.addf %88, %89 : vector<8x32xf32>
    %91 = arith.addf %90, %83 : vector<8x32xf32>
    %cst_50 = arith.constant 1.000000e+00 : f32
    %92 = vector.broadcast %cst_50 : f32 to vector<8x32xf32>
    %93 = arith.cmpf ogt, %91, %92 : vector<8x32xf32>
    %94 = arith.extui %93 : vector<8x32xi1> to vector<8x32xi32>
    %95 = arith.sitofp %94 : vector<8x32xi32> to vector<8x32xf32>
    %c0_51 = arith.constant 0 : index
    %c160 = arith.constant 160 : index
    %96 = vector.load %arg6[%c0_51, %c160] : memref<8x256xf32, #tpu.memory_space<vmem>>, vector<8x32xf32>
    tpu.vector_store %arg6[%c0_51, %c160], %91 {strides = array<i32>} : memref<8x256xf32, #tpu.memory_space<vmem>>, vector<8x32xf32>,
    %c0_52 = arith.constant 0 : index
    %c160_53 = arith.constant 160 : index
    %97 = vector.load %arg7[%c0_52, %c160_53] : memref<8x256xf32, #tpu.memory_space<vmem>>, vector<8x32xf32>
    tpu.vector_store %arg7[%c0_52, %c160_53], %95 {strides = array<i32>} : memref<8x256xf32, #tpu.memory_space<vmem>>, vector<8x32xf32>,
    %cst_54 = arith.constant dense<0.000000e+00> : vector<8x32xf32>
    %98 = tpu.matmul %95, %3, %cst_54 {dimension_numbers = #tpu.dot_dimension_numbers<[1], [0], [0], [1], [0, 0, 1, 1], [], []>} : vector<8x32xf32>, vector<32x32xf32>, vector<8x32xf32> -> vector<8x32xf32>
    %cst_55 = arith.constant 0.904837429 : f32
    %99 = vector.broadcast %cst_55 : f32 to vector<8x32xf32>
    %100 = arith.mulf %99, %91 : vector<8x32xf32>
    %cst_56 = arith.constant 1.000000e+00 : f32
    %101 = vector.broadcast %cst_56 : f32 to vector<8x32xf32>
    %102 = arith.subf %101, %95 : vector<8x32xf32>
    %103 = arith.mulf %100, %102 : vector<8x32xf32>
    %104 = vector.extract_strided_slice %2 {offsets = [48, 0], sizes = [8, 32], strides = [1, 1]} : vector<64x32xf32> to vector<8x32xf32>
    %105 = arith.addf %103, %104 : vector<8x32xf32>
    %106 = arith.addf %105, %98 : vector<8x32xf32>
    %cst_57 = arith.constant 1.000000e+00 : f32
    %107 = vector.broadcast %cst_57 : f32 to vector<8x32xf32>
    %108 = arith.cmpf ogt, %106, %107 : vector<8x32xf32>
    %109 = arith.extui %108 : vector<8x32xi1> to vector<8x32xi32>
    %110 = arith.sitofp %109 : vector<8x32xi32> to vector<8x32xf32>
    %c0_58 = arith.constant 0 : index
    %c192 = arith.constant 192 : index
    %111 = vector.load %arg6[%c0_58, %c192] : memref<8x256xf32, #tpu.memory_space<vmem>>, vector<8x32xf32>
    tpu.vector_store %arg6[%c0_58, %c192], %106 {strides = array<i32>} : memref<8x256xf32, #tpu.memory_space<vmem>>, vector<8x32xf32>,
    %c0_59 = arith.constant 0 : index
    %c192_60 = arith.constant 192 : index
    %112 = vector.load %arg7[%c0_59, %c192_60] : memref<8x256xf32, #tpu.memory_space<vmem>>, vector<8x32xf32>
    tpu.vector_store %arg7[%c0_59, %c192_60], %110 {strides = array<i32>} : memref<8x256xf32, #tpu.memory_space<vmem>>, vector<8x32xf32>,
    %cst_61 = arith.constant dense<0.000000e+00> : vector<8x32xf32>
    %113 = tpu.matmul %110, %3, %cst_61 {dimension_numbers = #tpu.dot_dimension_numbers<[1], [0], [0], [1], [0, 0, 1, 1], [], []>} : vector<8x32xf32>, vector<32x32xf32>, vector<8x32xf32> -> vector<8x32xf32>
    %cst_62 = arith.constant 0.904837429 : f32
    %114 = vector.broadcast %cst_62 : f32 to vector<8x32xf32>
    %115 = arith.mulf %114, %106 : vector<8x32xf32>
    %cst_63 = arith.constant 1.000000e+00 : f32
    %116 = vector.broadcast %cst_63 : f32 to vector<8x32xf32>
    %117 = arith.subf %116, %110 : vector<8x32xf32>
    %118 = arith.mulf %115, %117 : vector<8x32xf32>
    %119 = vector.extract_strided_slice %2 {offsets = [56, 0], sizes = [8, 32], strides = [1, 1]} : vector<64x32xf32> to vector<8x32xf32>
    %120 = arith.addf %118, %119 : vector<8x32xf32>
    %121 = arith.addf %120, %113 : vector<8x32xf32>
    %cst_64 = arith.constant 1.000000e+00 : f32
    %122 = vector.broadcast %cst_64 : f32 to vector<8x32xf32>
    %123 = arith.cmpf ogt, %121, %122 : vector<8x32xf32>
    %124 = arith.extui %123 : vector<8x32xi1> to vector<8x32xi32>
    %125 = arith.sitofp %124 : vector<8x32xi32> to vector<8x32xf32>
    %c0_65 = arith.constant 0 : index
    %c224 = arith.constant 224 : index
    %126 = vector.load %arg6[%c0_65, %c224] : memref<8x256xf32, #tpu.memory_space<vmem>>, vector<8x32xf32>
    tpu.vector_store %arg6[%c0_65, %c224], %121 {strides = array<i32>} : memref<8x256xf32, #tpu.memory_space<vmem>>, vector<8x32xf32>,
    %c0_66 = arith.constant 0 : index
    %c224_67 = arith.constant 224 : index
    %127 = vector.load %arg7[%c0_66, %c224_67] : memref<8x256xf32, #tpu.memory_space<vmem>>, vector<8x32xf32>
    tpu.vector_store %arg7[%c0_66, %c224_67], %125 {strides = array<i32>} : memref<8x256xf32, #tpu.memory_space<vmem>>, vector<8x32xf32>,
    %128 = tpu.concatenate %20, %35, %50, %65, %80, %95, %110, %125 in 0 : vector<8x32xf32>, vector<8x32xf32>, vector<8x32xf32>, vector<8x32xf32>, vector<8x32xf32>, vector<8x32xf32>, vector<8x32xf32>, vector<8x32xf32> -> vector<64x32xf32>
    %cst_68 = arith.constant dense<0.000000e+00> : vector<64x16xf32>
    %129 = tpu.matmul %128, %4, %cst_68 {dimension_numbers = #tpu.dot_dimension_numbers<[1], [0], [0], [1], [0, 0, 1, 1], [], []>} : vector<64x32xf32>, vector<32x16xf32>, vector<64x16xf32> -> vector<64x16xf32>
    %cst_69 = arith.constant 0.000000e+00 : f32
    %130 = vector.broadcast %cst_69 : f32 to vector<8x16xf32>
    %cst_70 = arith.constant 0.904837429 : f32
    %131 = vector.broadcast %cst_70 : f32 to vector<8x16xf32>
    %132 = arith.mulf %131, %130 : vector<8x16xf32>
    %133 = vector.extract_strided_slice %129 {offsets = [0, 0], sizes = [8, 16], strides = [1, 1]} : vector<64x16xf32> to vector<8x16xf32>
    %134 = arith.addf %132, %133 : vector<8x16xf32>
    %135 = vector.broadcast %5 : vector<1x16xf32> to vector<8x16xf32>
    %136 = arith.addf %134, %135 : vector<8x16xf32>
    %c0_71 = arith.constant 0 : index
    %c0_72 = arith.constant 0 : index
    %137 = vector.load %arg5[%c0_71, %c0_72] : memref<8x128xf32, #tpu.memory_space<vmem>>, vector<8x16xf32>
    tpu.vector_store %arg5[%c0_71, %c0_72], %136 {strides = array<i32>} : memref<8x128xf32, #tpu.memory_space<vmem>>, vector<8x16xf32>,
    %cst_73 = arith.constant 0.904837429 : f32
    %138 = vector.broadcast %cst_73 : f32 to vector<8x16xf32>
    %139 = arith.mulf %138, %136 : vector<8x16xf32>
    %140 = vector.extract_strided_slice %129 {offsets = [8, 0], sizes = [8, 16], strides = [1, 1]} : vector<64x16xf32> to vector<8x16xf32>
    %141 = arith.addf %139, %140 : vector<8x16xf32>
    %142 = vector.broadcast %5 : vector<1x16xf32> to vector<8x16xf32>
    %143 = arith.addf %141, %142 : vector<8x16xf32>
    %c0_74 = arith.constant 0 : index
    %c16 = arith.constant 16 : index
    %144 = vector.load %arg5[%c0_74, %c16] : memref<8x128xf32, #tpu.memory_space<vmem>>, vector<8x16xf32>
    tpu.vector_store %arg5[%c0_74, %c16], %143 {strides = array<i32>} : memref<8x128xf32, #tpu.memory_space<vmem>>, vector<8x16xf32>,
    %cst_75 = arith.constant 0.904837429 : f32
    %145 = vector.broadcast %cst_75 : f32 to vector<8x16xf32>
    %146 = arith.mulf %145, %143 : vector<8x16xf32>
    %147 = vector.extract_strided_slice %129 {offsets = [16, 0], sizes = [8, 16], strides = [1, 1]} : vector<64x16xf32> to vector<8x16xf32>
    %148 = arith.addf %146, %147 : vector<8x16xf32>
    %149 = vector.broadcast %5 : vector<1x16xf32> to vector<8x16xf32>
    %150 = arith.addf %148, %149 : vector<8x16xf32>
    %c0_76 = arith.constant 0 : index
    %c32_77 = arith.constant 32 : index
    %151 = vector.load %arg5[%c0_76, %c32_77] : memref<8x128xf32, #tpu.memory_space<vmem>>, vector<8x16xf32>
    tpu.vector_store %arg5[%c0_76, %c32_77], %150 {strides = array<i32>} : memref<8x128xf32, #tpu.memory_space<vmem>>, vector<8x16xf32>,
    %cst_78 = arith.constant 0.904837429 : f32
    %152 = vector.broadcast %cst_78 : f32 to vector<8x16xf32>
    %153 = arith.mulf %152, %150 : vector<8x16xf32>
    %154 = vector.extract_strided_slice %129 {offsets = [24, 0], sizes = [8, 16], strides = [1, 1]} : vector<64x16xf32> to vector<8x16xf32>
    %155 = arith.addf %153, %154 : vector<8x16xf32>
    %156 = vector.broadcast %5 : vector<1x16xf32> to vector<8x16xf32>
    %157 = arith.addf %155, %156 : vector<8x16xf32>
    %c0_79 = arith.constant 0 : index
    %c48 = arith.constant 48 : index
    %158 = vector.load %arg5[%c0_79, %c48] : memref<8x128xf32, #tpu.memory_space<vmem>>, vector<8x16xf32>
    tpu.vector_store %arg5[%c0_79, %c48], %157 {strides = array<i32>} : memref<8x128xf32, #tpu.memory_space<vmem>>, vector<8x16xf32>,
    %cst_80 = arith.constant 0.904837429 : f32
    %159 = vector.broadcast %cst_80 : f32 to vector<8x16xf32>
    %160 = arith.mulf %159, %157 : vector<8x16xf32>
    %161 = vector.extract_strided_slice %129 {offsets = [32, 0], sizes = [8, 16], strides = [1, 1]} : vector<64x16xf32> to vector<8x16xf32>
    %162 = arith.addf %160, %161 : vector<8x16xf32>
    %163 = vector.broadcast %5 : vector<1x16xf32> to vector<8x16xf32>
    %164 = arith.addf %162, %163 : vector<8x16xf32>
    %c0_81 = arith.constant 0 : index
    %c64_82 = arith.constant 64 : index
    %165 = vector.load %arg5[%c0_81, %c64_82] : memref<8x128xf32, #tpu.memory_space<vmem>>, vector<8x16xf32>
    tpu.vector_store %arg5[%c0_81, %c64_82], %164 {strides = array<i32>} : memref<8x128xf32, #tpu.memory_space<vmem>>, vector<8x16xf32>,
    %cst_83 = arith.constant 0.904837429 : f32
    %166 = vector.broadcast %cst_83 : f32 to vector<8x16xf32>
    %167 = arith.mulf %166, %164 : vector<8x16xf32>
    %168 = vector.extract_strided_slice %129 {offsets = [40, 0], sizes = [8, 16], strides = [1, 1]} : vector<64x16xf32> to vector<8x16xf32>
    %169 = arith.addf %167, %168 : vector<8x16xf32>
    %170 = vector.broadcast %5 : vector<1x16xf32> to vector<8x16xf32>
    %171 = arith.addf %169, %170 : vector<8x16xf32>
    %c0_84 = arith.constant 0 : index
    %c80 = arith.constant 80 : index
    %172 = vector.load %arg5[%c0_84, %c80] : memref<8x128xf32, #tpu.memory_space<vmem>>, vector<8x16xf32>
    tpu.vector_store %arg5[%c0_84, %c80], %171 {strides = array<i32>} : memref<8x128xf32, #tpu.memory_space<vmem>>, vector<8x16xf32>,
    %cst_85 = arith.constant 0.904837429 : f32
    %173 = vector.broadcast %cst_85 : f32 to vector<8x16xf32>
    %174 = arith.mulf %173, %171 : vector<8x16xf32>
    %175 = vector.extract_strided_slice %129 {offsets = [48, 0], sizes = [8, 16], strides = [1, 1]} : vector<64x16xf32> to vector<8x16xf32>
    %176 = arith.addf %174, %175 : vector<8x16xf32>
    %177 = vector.broadcast %5 : vector<1x16xf32> to vector<8x16xf32>
    %178 = arith.addf %176, %177 : vector<8x16xf32>
    %c0_86 = arith.constant 0 : index
    %c96_87 = arith.constant 96 : index
    %179 = vector.load %arg5[%c0_86, %c96_87] : memref<8x128xf32, #tpu.memory_space<vmem>>, vector<8x16xf32>
    tpu.vector_store %arg5[%c0_86, %c96_87], %178 {strides = array<i32>} : memref<8x128xf32, #tpu.memory_space<vmem>>, vector<8x16xf32>,
    %cst_88 = arith.constant 0.904837429 : f32
    %180 = vector.broadcast %cst_88 : f32 to vector<8x16xf32>
    %181 = arith.mulf %180, %178 : vector<8x16xf32>
    %182 = vector.extract_strided_slice %129 {offsets = [56, 0], sizes = [8, 16], strides = [1, 1]} : vector<64x16xf32> to vector<8x16xf32>
    %183 = arith.addf %181, %182 : vector<8x16xf32>
    %184 = vector.broadcast %5 : vector<1x16xf32> to vector<8x16xf32>
    %185 = arith.addf %183, %184 : vector<8x16xf32>
    %c0_89 = arith.constant 0 : index
    %c112 = arith.constant 112 : index
    %186 = vector.load %arg5[%c0_89, %c112] : memref<8x128xf32, #tpu.memory_space<vmem>>, vector<8x16xf32>
    tpu.vector_store %arg5[%c0_89, %c112], %185 {strides = array<i32>} : memref<8x128xf32, #tpu.memory_space<vmem>>, vector<8x16xf32>,
    return
  }
}

</mosaic_0001>

<bundles_post_ra>
// kernel: tpu_custom_call.1
= control target key start
LH: loop header
LB: loop body
LE: loop exit
PB: predicated region body
PF: predicated region fallthrough
CT: control target
= control target key end

     0   :  { %13 = vsyncpa [#allocation3], 0  ;;  %vm37_vm0 = vcmask 261120   ;;  %s1804_s0 = inlined_call_operand.vmem [shape: f32[64,32], index: 0, kind: input, shape index: {}]   ;;  %s1805_s1 = inlined_call_operand.vmem [shape: f32[32,32], index: 1, kind: input, shape index: {}]   ;;  %s1806_s2 = inlined_call_operand.vmem [shape: f32[32,32], index: 2, kind: input, shape index: {}]   ;;  %s1807_s3 = inlined_call_operand.vmem [shape: f32[32,16], index: 3, kind: input, shape index: {}]   ;;  %s1808_s4 = inlined_call_operand.vmem [shape: f32[1,16], index: 4, kind: input, shape index: {}]   ;;  %s1809_s5 = inlined_call_operand.hbm [shape: f32[8,128], index: 5, kind: output, shape index: {0}]   ;;  %s1810_s6 = inlined_call_operand.hbm [shape: f32[8,256], index: 6, kind: output, shape index: {1}]   ;;  %s1811_s7 = inlined_call_operand.hbm [shape: f32[8,256], index: 7, kind: output, shape index: {2}]  }
   0x1   :  { %v33_v0 = vld [vmem:[%s1805_s1] sm:$0xff]  ;;  %v34_v1 = vld [vmem:[%s1805_s1 + $0x8] sm:$0xff]  ;;  %v35_v2 = vld [vmem:[%s1805_s1 + $0x10] sm:$0xff] }
   0x2   :  { %v1328_v3 = vpack.c.bf16 %v34_v1, %v33_v0  ;;  %v36_v4 = vld [vmem:[%s1805_s1 + $0x18] sm:$0xff]  ;;  %v29_v5 = vld [vmem:[%s1804_s0 + $0x20] sm:$0xff] }
   0x3   :  { %v1332_v6 = vpack.c.bf16 %v36_v4, %v35_v2  ;;  %1214 = vmatprep.mubr.msk.f32.mxu1 %vm37_vm0, %v29_v5  ;;  %v25_v7 = vld [vmem:[%s1804_s0] sm:$0xff] }
   0x4   :  { %1392 = vmatprep.subr.bf16.mxu1 %v1328_v3  ;;  %1329 = vmatprep.subr.bf16.mxu0 %v1328_v3 }
   0x5   :  { %1394 = vmatpush3.bf16.msra.mxu1 %v1328_v3  ;;  %1331 = vmatpush3.bf16.msra.mxu0 %v1328_v3 }
   0x6   :  { %14 = vsyncpa [#allocation5], 0  ;;  %1393 = vmatprep.subr.bf16.mxu1 %v1332_v6  ;;  %v167_v8 = vld [vmem:[%s1806_s2] sm:$0xff]  ;;  %v168_v9 = vld [vmem:[%s1806_s2 + $0x8] sm:$0xff]  ;;  %1333 = vmatprep.subr.bf16.mxu0 %v1332_v6  ;;  %v1494_v13 = vmov 0.0|0.0   ;;  %vm1495_vm1 = vmmov 0  }
   0x7   :  { %1208 = vmatprep.mubr.msk.f32.mxu0 %vm37_vm0, %v25_v7  ;;  %v30_v10 = vld [vmem:[%s1804_s0 + $0x28] sm:$0xff]  ;;  %v1576_v11 = vpack.c.bf16 %v168_v9, %v167_v8  ;;  %v31_v14 = vld [vmem:[%s1804_s0 + $0x30] sm:$0xff]  ;;  %v170_v16 = vld [vmem:[%s1806_s2 + $0x18] sm:$0xff]  ;;  %v1496_v19 = vmov 0.0   ;;  %vm341_vm4 = vcmask 523520   ;;  %s1498_s8 = smov 64  }
   0x8   :  { %v26_v12 = vld [vmem:[%s1804_s0 + $0x8] sm:$0xff]  ;;  %v169_v15 = vld [vmem:[%s1806_s2 + $0x10] sm:$0xff]  ;;  %v32_v17 = vld [vmem:[%s1804_s0 + $0x38] sm:$0xff]  ;;  %vm432_vm6 = vcmask 785920   ;;  %s1499_s9 = smov 96   ;;  %vm523_vm8 = vcmask 1048320  }
   0x9   :  { %1395 = vmatpush3.bf16.msra.mxu1 %v1332_v6  ;;  %1335 = vmatpush3.bf16.msra.mxu0 %v1332_v6  ;;  %v1599_v18 = vpack.c.bf16 %v170_v16, %v169_v15  ;;  %v27_v20 = vld [vmem:[%s1804_s0 + $0x10] sm:$0xff]  ;;  %v28_v21 = vld [vmem:[%s1804_s0 + $0x18] sm:$0xff]  ;;  %s1497_s0 = smov 32   ;;  %v171_v9 = vld [vmem:[%s1807_s3] sm:$0xff]  ;;  %vm998_vm12 = vcmask 130048   ;;  %s1501_s18 = smov 48  }
   0xa   :  { %1336 = vmatprep.subr.bf16.mxu1 %v1494_v13  ;;  %1348 = vmatprep.subr.bf16.mxu0 %v1494_v13  ;;  %s1502_s19 = smov 80   ;;  %vm1007_vm13 = vcmask 261248   ;;  %vm1016_vm14 = vcmask 392448   ;;  %vm1025_vm15 = vcmask 523648   ;;  %s1503_s20 = smov [#allocation4]  }
   0xb   :  { %s1079_s21 = sshll.u32 %s1503_s20, 4  ;;  %s1080_s21 = int_to_ptr.vmem [resolvable:$true] %s1079_s21 }
   0xc   :  { %1215 = vmatmul.mubr.msk.f32.vlgmr.msra.gmra.mrb[0].mxu1 %vm37_vm0, %v30_v10  ;;  %1209 = vmatmul.mubr.msk.f32.vlgmr.msra.gmra.mrb[0].mxu0 %vm37_vm0, %v26_v12  ;;  %v172_v10 = vld [vmem:[%s1807_s3 + $0x8] sm:$0xff]  ;;  %s1424_s22 = scalar_lea.vmem %s1080_s21, 256  ;;  %p1429_p1 = scmp.lt.s32.totalorder %s1080_s21, %s1080_s21 }
   0xd   :  { %1338 = vmatpush3.bf16.msra.mxu1 %v1576_v11  ;;  %1217 = vmatprep.mubr.msk.f32.mxu1 %vm37_vm0, %v31_v14  ;;  %v1384_v12 = vpack.c.bf16 %v172_v10, %v171_v9  ;;  %v173_v14 = vld [vmem:[%s1807_s3 + $0x10] sm:$0xff]  ;;  %p1425_p0 = scmp.ne.s32.totalorder %s1080_s21, %s1424_s22  ;;  %p1430_p2 = scmp.lt.s32.totalorder %s1424_s22, %s1424_s22 }
   0xe   :  { %1339 = vmatprep.subr.bf16.mxu1 %v1494_v13  ;;  %1350 = vmatpush3.bf16.msra.mxu0 %v1576_v11 }
   0xf   :  { %1351 = vmatprep.subr.bf16.mxu0 %v1494_v13  ;;  %1211 = vmatprep.mubr.msk.f32.mxu0 %vm37_vm0, %v27_v20  ;;  %p1431_p3 = por %p1430_p2, %p1429_p1 }
  0x10   :  { %1218 = vmatmul.mubr.msk.f32.gmra.mrb[2].mxu1 %vm37_vm0, %v32_v17  ;;  %1212 = vmatmul.mubr.msk.f32.gmra.mrb[2].mxu0 %vm37_vm0, %v28_v21 }
  0x11   :  { %1341 = vmatpush3.bf16.msra.mxu1 %v1599_v18  ;;  %1228 = vmatprep.mubr.msk.f32.mxu1 %vm1495_vm1, %v1496_v19  ;;  %p1432_p4 = pnand %p1431_p3, %p1425_p0 }
  0x12   :  { %1342 = vmatprep.subr.bf16.mxu1 %v1494_v13  ;;  %1353 = vmatpush3.bf16.msra.mxu0 %v1599_v18 }
  0x13   :  { %1360 = vmatprep.subr.bf16.mxu0 %v1494_v13  ;;  %1250 = vmatprep.mubr.msk.f32.mxu0 %vm1495_vm1, %v1496_v19 }
  0x14   :  { %1229 = vmatmul.mubr.f32.vlgmr.msra.gmra.mrb[4].mxu1 %v1496_v19 }
  0x15   :  { %1344 = vmatpush3.bf16.msra.mxu1 %v1576_v11  ;;  %1239 = vmatprep.mubr.msk.f32.mxu1 %vm1495_vm1, %v1496_v19 }
  0x16   :  { %1345 = vmatprep.subr.bf16.mxu1 %v1494_v13 }
  0x19   :  { %1347 = vmatpush3.bf16.msra.mxu1 %v1599_v18 }
  0x1a   :  { %1354 = vmatprep.subr.bf16.mxu1 %v1494_v13 }
  0xdf   :  { %v1628_v22 = vpop.f32.mrb[0].mxu1  ;;  %v1210_v23 = vpop.f32.mrb[0].mxu0 }
  0xe0   :  { %v1630_v24 = vpop.f32.mrb[1].mxu1  ;;  %v128_v25 = vpop.f32.mrb[1].mxu0 }
  0xe3   :  { %v1632_v26 = vpop.f32.mrb[2].mxu1  ;;  %v1213_v36 = vpop.f32.mrb[2].mxu0 }
  0xe4   :  { %v1634_v27 = vpop.f32.mrb[3].mxu1  ;;  %v138_v37 = vpop.f32.mrb[3].mxu0 }
  0xe7   :  { %v245_v28 = vpop.f32.mrb[4].mxu1 }
  0xe8   :  { %v250_v29 = vadd.f32 %v245_v28, %v128_v25  ;;  %v1230_v30 = vpop.f32.mrb[5].mxu1 }
  0xea   :  { %vm251_vm2 = vcmp.gt.f32.partialorder %v250_v29, 1.0  ;;  %254 = vst.msk [vmem:[#allocation4] sm:$0xff] %vm37_vm0, %v250_v29  ;;  %v329_v32 = vmul.f32 0.9048374, %v250_v29 }
  0xeb   :  { %v1638_v31 = vsel %vm251_vm2, 1.0, %v1496_v19  ;;  %vm1043_vm2 = vcmask 786048  }
  0xec   :  { %1240 = vmatmul.mubr.msk.f32.vlgmr.msra.gmra.mrb[6].mxu1 %vm37_vm0, %v1638_v31  ;;  %255 = vst.msk [vmem:[#allocation6] sm:$0xff] %vm37_vm0, %v1638_v31  ;;  %v330_v33 = vsub.f32 1.0, %v1638_v31 }
  0xed   :  { %1356 = vmatpush3.bf16.msra.mxu1 %v1576_v11  ;;  %1261 = vmatprep.mubr.msk.f32.mxu1 %vm1495_vm1, %v1496_v19 }
  0xee   :  { %v331_v34 = vmul.f32 %v330_v33, %v329_v32  ;;  %1357 = vmatprep.subr.bf16.mxu1 %v1494_v13 }
  0xf0   :  { %v332_v35 = vadd.f32 %v1210_v23, %v331_v34 }
  0xf1   :  { %1359 = vmatpush3.bf16.msra.mxu1 %v1599_v18 }
  0xf2   :  { %1366 = vmatprep.subr.bf16.mxu1 %v1494_v13 }
 0x1bf   :  { %v325_v38 = vpop.f32.mrb[6].mxu1 }
 0x1c0   :  { %v333_v39 = vadd.f32 %v332_v35, %v325_v38  ;;  %v1241_v40 = vpop.f32.mrb[7].mxu1 }
 0x1c2   :  { %vm334_vm3 = vcmp.gt.f32.partialorder %v333_v39, 1.0  ;;  %338 = vrot.lane.b32.xlu1 %v333_v39, %s1497_s0  ;;  %v420_v42 = vmul.f32 0.9048374, %v333_v39 }
 0x1c3   :  { %v1653_v41 = vsel %vm334_vm3, 1.0, %v1496_v19 }
 0x1c4   :  { %1251 = vmatmul.mubr.msk.f32.vlgmr.msra.gmra.mrb[4].mxu0 %vm37_vm0, %v1653_v41  ;;  %v421_v43 = vsub.f32 1.0, %v1653_v41 }
 0x1c5   :  { %1362 = vmatpush3.bf16.msra.mxu0 %v1576_v11  ;;  %1272 = vmatprep.mubr.msk.f32.mxu0 %vm1495_vm1, %v1496_v19 }
 0x1c6   :  { %v422_v44 = vmul.f32 %v421_v43, %v420_v42  ;;  %1363 = vmatprep.subr.bf16.mxu0 %v1494_v13 }
 0x1c8   :  { %v423_v45 = vadd.f32 %v422_v44, %v138_v37  ;;  %v1743_v37 = vld [vmem:[%s1808_s4] ss:$0 sm:$0xff]  ;;  %s1500_s4 = smov 16  }
 0x1c9   :  { %1365 = vmatpush3.bf16.msra.mxu0 %v1599_v18 }
 0x1ca   :  { %1372 = vmatprep.subr.bf16.mxu0 %v1494_v13 }
 0x234   :  { %v339_v46 = vpop.permute.xlu1 %338 }
 0x235   :  { %342 = vst.msk [vmem:[#allocation4] sm:$0xff] %vm341_vm4, %v339_v46 }
 0x297   :  { %v416_v47 = vpop.f32.mrb[4].mxu0 }
 0x298   :  { %v424_v48 = vadd.f32 %v423_v45, %v416_v47  ;;  %v1252_v49 = vpop.f32.mrb[5].mxu0 }
 0x29a   :  { %vm425_vm5 = vcmp.gt.f32.partialorder %v424_v48, 1.0  ;;  %429 = vrot.lane.b32.xlu1 %v424_v48, %s1498_s8  ;;  %v511_v51 = vmul.f32 0.9048374, %v424_v48 }
 0x29b   :  { %v1667_v50 = vsel %vm425_vm5, 1.0, %v1496_v19 }
 0x29c   :  { %1262 = vmatmul.mubr.msk.f32.vlgmr.msra.gmra.mrb[8].mxu1 %vm37_vm0, %v1667_v50  ;;  %v512_v52 = vsub.f32 1.0, %v1667_v50 }
 0x29d   :  { %1368 = vmatpush3.bf16.msra.mxu1 %v1576_v11  ;;  %1283 = vmatprep.mubr.msk.f32.mxu1 %vm1495_vm1, %v1496_v19 }
 0x29e   :  { %v513_v53 = vmul.f32 %v512_v52, %v511_v51  ;;  %1369 = vmatprep.subr.bf16.mxu1 %v1494_v13 }
 0x2a0   :  { %v514_v54 = vadd.f32 %v1213_v36, %v513_v53 }
 0x2a1   :  { %1371 = vmatpush3.bf16.msra.mxu1 %v1599_v18 }
 0x2a2   :  { %1378 = vmatprep.subr.bf16.mxu1 %v1494_v13 }
 0x30c   :  { %v430_v55 = vpop.permute.xlu1 %429 }
 0x30d   :  { %433 = vst.msk [vmem:[#allocation4] sm:$0xff] %vm432_vm6, %v430_v55 }
 0x36f   :  { %v507_v56 = vpop.f32.mrb[8].mxu1 }
 0x370   :  { %v515_v57 = vadd.f32 %v514_v54, %v507_v56  ;;  %v1263_v58 = vpop.f32.mrb[9].mxu1 }
 0x372   :  { %vm516_vm7 = vcmp.gt.f32.partialorder %v515_v57, 1.0  ;;  %520 = vrot.lane.b32.xlu1 %v515_v57, %s1499_s9  ;;  %v602_v60 = vmul.f32 0.9048374, %v515_v57 }
 0x373   :  { %v1681_v59 = vsel %vm516_vm7, 1.0, %v1496_v19 }
 0x374   :  { %1273 = vmatmul.mubr.msk.f32.vlgmr.msra.gmra.mrb[6].mxu0 %vm37_vm0, %v1681_v59  ;;  %v603_v61 = vsub.f32 1.0, %v1681_v59 }
 0x375   :  { %1374 = vmatpush3.bf16.msra.mxu0 %v1576_v11  ;;  %1294 = vmatprep.mubr.msk.f32.mxu0 %vm1495_vm1, %v1496_v19 }
 0x376   :  { %v604_v62 = vmul.f32 %v603_v61, %v602_v60  ;;  %1375 = vmatprep.subr.bf16.mxu0 %v1494_v13 }
 0x378   :  { %v605_v63 = vadd.f32 %v604_v62, %v1630_v24 }
 0x379   :  { %1377 = vmatpush3.bf16.msra.mxu0 %v1599_v18 }
 0x37a   :  { %1385 = vmatprep.subr.bf16.mxu0 %v1384_v12 }
 0x3e4   :  { %v521_v0 = vpop.permute.xlu1 %520 }
 0x3e5   :  { %524 = vst.msk [vmem:[#allocation4] sm:$0xff] %vm523_vm8, %v521_v0 }
 0x447   :  { %v598_v1 = vpop.f32.mrb[6].mxu0 }
 0x448   :  { %v606_v2 = vadd.f32 %v605_v63, %v598_v1  ;;  %v1274_v3 = vpop.f32.mrb[7].mxu0 }
 0x44a   :  { %vm607_vm9 = vcmp.gt.f32.partialorder %v606_v2, 1.0  ;;  %610 = vst.msk [vmem:[#allocation4 + $0x8] sm:$0xff] %vm37_vm0, %v606_v2  ;;  %v685_v5 = vmul.f32 0.9048374, %v606_v2 }
 0x44b   :  { %v1120_v4 = vsel %vm607_vm9, 1.0, %v1496_v19 }
 0x44c   :  { %1284 = vmatmul.mubr.msk.f32.vlgmr.msra.gmra.mrb[10].mxu1 %vm37_vm0, %v1120_v4  ;;  %611 = vst.msk [vmem:[#allocation6 + $0x8] sm:$0xff] %vm37_vm0, %v1120_v4  ;;  %v686_v6 = vsub.f32 1.0, %v1120_v4 }
 0x44d   :  { %1380 = vmatpush3.bf16.msra.mxu1 %v1576_v11  ;;  %1305 = vmatprep.mubr.msk.f32.mxu1 %vm1495_vm1, %v1496_v19  ;;  %vm1034_vm1 = vcmask 654848  }
 0x44e   :  { %v687_v7 = vmul.f32 %v686_v6, %v685_v5  ;;  %1381 = vmatprep.subr.bf16.mxu1 %v1494_v13  ;;  %v174_v13 = vld [vmem:[%s1807_s3 + $0x18] sm:$0xff] }
 0x44f   :  { %v1388_v17 = vpack.c.bf16 %v174_v13, %v173_v14 }
 0x450   :  { %v688_v8 = vadd.f32 %v1628_v22, %v687_v7 }
 0x451   :  { %1383 = vmatpush3.bf16.msra.mxu1 %v1599_v18 }
 0x51f   :  { %v681_v11 = vpop.f32.mrb[10].mxu1 }
 0x520   :  { %v689_v15 = vadd.f32 %v688_v8, %v681_v11  ;;  %v1285_v16 = vpop.f32.mrb[11].mxu1 }
 0x522   :  { %vm690_vm10 = vcmp.gt.f32.partialorder %v689_v15, 1.0  ;;  %694 = vrot.lane.b32.xlu0 %v689_v15, %s1497_s0  ;;  %v775_v20 = vmul.f32 0.9048374, %v689_v15 }
 0x523   :  { %v1122_v18 = vsel %vm690_vm10, 1.0, %v1496_v19 }
 0x524   :  { %1295 = vmatmul.mubr.msk.f32.vlgmr.msra.gmra.mrb[8].mxu0 %vm37_vm0, %v1122_v18  ;;  %v1409_v21 = vpack.i.bf16 %v1122_v18, %v1653_v41  ;;  %v776_v22 = vsub.f32 1.0, %v1122_v18 }
 0x525   :  { %1387 = vmatpush3.bf16.msra.mxu0 %v1384_v12  ;;  %1316 = vmatprep.mubr.msk.f32.mxu0 %vm37_vm0, %v1638_v31 }
 0x526   :  { %1410 = vrot.lane.b32.xlu0 %v1409_v21, %s1497_s0  ;;  %1389 = vmatprep.subr.bf16.mxu0 %v1388_v17  ;;  %v777_v23 = vmul.f32 %v776_v22, %v775_v20 }
 0x528   :  { %v778_v24 = vadd.f32 %v777_v23, %v1634_v27 }
 0x529   :  { %1391 = vmatpush3.bf16.msra.mxu0 %v1388_v17 }
 0x52c   :  { %1317 = vmatmul.mubr.msk.f32.vlgmr.msra.gmra.mrb[10].mxu0 %vm37_vm0, %v1653_v41 }
 0x52d   :  { %1319 = vmatprep.mubr.msk.f32.mxu0 %vm37_vm0, %v1667_v50 }
 0x530   :  { %1320 = vmatmul.mubr.msk.f32.gmra.mrb[12].mxu0 %vm37_vm0, %v1681_v59 }
 0x531   :  { %1322 = vmatprep.mubr.msk.f32.mxu0 %vm37_vm0, %v1120_v4 }
 0x534   :  { %1323 = vmatmul.mubr.msk.f32.gmra.mrb[14].mxu0 %vm37_vm0, %v1122_v18 }
 0x594   :  { %v695_v25 = vpop.permute.xlu0 %694 }
 0x595   :  { %697 = vst.msk [vmem:[#allocation4 + $0x8] sm:$0xff] %vm341_vm4, %v695_v25 }
 0x598   :  { %v1411_v28 = vpop.permute.xlu0 %1410 }
 0x599   :  { %v1413_v29 = vunpack.i.h.bf16 %v1411_v28  ;;  %v1412_v27 = vunpack.i.l.bf16 %v1411_v28 }
 0x59b   :  { %347 = vst.msk [vmem:[#allocation6] sm:$0xff] %vm341_vm4, %v1412_v27  ;;  %702 = vst.msk [vmem:[#allocation6 + $0x8] sm:$0xff] %vm341_vm4, %v1413_v29 }
 0x5f7   :  { %v771_v30 = vpop.f32.mrb[8].mxu0 }
 0x5f8   :  { %v779_v31 = vadd.f32 %v778_v24, %v771_v30  ;;  %v1296_v32 = vpop.f32.mrb[9].mxu0 }
 0x5fa   :  { %vm780_vm11 = vcmp.gt.f32.partialorder %v779_v31, 1.0  ;;  %784 = vrot.lane.b32.xlu0 %v779_v31, %s1498_s8  ;;  %v865_v34 = vmul.f32 0.9048374, %v779_v31 }
 0x5fb   :  { %v1124_v33 = vsel %vm780_vm11, 1.0, %v1496_v19 }
 0x5fc   :  { %1306 = vmatmul.mubr.msk.f32.vlgmr.msra.gmra.mrb[12].mxu1 %vm37_vm0, %v1124_v33  ;;  %1325 = vmatprep.mubr.msk.f32.mxu0 %vm37_vm0, %v1124_v33  ;;  %v1414_v35 = vpack.i.bf16 %v1124_v33, %v1667_v50  ;;  %v866_v36 = vsub.f32 1.0, %v1124_v33 }
 0x5fe   :  { %1415 = vrot.lane.b32.xlu0 %v1414_v35, %s1498_s8  ;;  %v867_v38 = vmul.f32 %v866_v36, %v865_v34 }
 0x5ff   :  { %v1318_v39 = vpop.f32.mrb[10].mxu0 }
 0x600   :  { %v951_v40 = vpop.f32.mrb[11].mxu0  ;;  %v868_v41 = vadd.f32 %v1632_v26, %v867_v38 }
 0x601   :  { %v997_v42 = vadd.f32 %v1743_v37, %v951_v40 }
 0x603   :  { %999 = vst.msk [vmem:[#allocation2] sm:$0xff] %vm998_vm12, %v997_v42  ;;  %v1000_v43 = vmul.f32 0.9048374, %v997_v42  ;;  %v1321_v44 = vpop.f32.mrb[12].mxu0 }
 0x604   :  { %v961_v45 = vpop.f32.mrb[13].mxu0 }
 0x605   :  { %v1001_v46 = vadd.f32 %v1318_v39, %v1000_v43 }
 0x607   :  { %v1002_v47 = vadd.f32 %v1743_v37, %v1001_v46  ;;  %v1324_v48 = vpop.f32.mrb[14].mxu0 }
 0x608   :  { %v971_v49 = vpop.f32.mrb[15].mxu0 }
 0x609   :  { %v1009_v50 = vmul.f32 0.9048374, %v1002_v47  ;;  %1004 = vrot.lane.b32.xlu0 %v1002_v47, %s1500_s4 }
 0x60b   :  { %v1010_v51 = vadd.f32 %v1009_v50, %v961_v45 }
 0x60d   :  { %v1011_v52 = vadd.f32 %v1743_v37, %v1010_v51 }
 0x60f   :  { %v1018_v53 = vmul.f32 0.9048374, %v1011_v52  ;;  %1013 = vrot.lane.b32.xlu0 %v1011_v52, %s1497_s0 }
 0x611   :  { %v1019_v26 = vadd.f32 %v1321_v44, %v1018_v53 }
 0x613   :  { %v1020_v54 = vadd.f32 %v1743_v37, %v1019_v26 }
 0x615   :  { %v1027_v55 = vmul.f32 0.9048374, %v1020_v54  ;;  %1022 = vrot.lane.b32.xlu1 %v1020_v54, %s1501_s18 }
 0x617   :  { %v1028_v56 = vadd.f32 %v1027_v55, %v971_v49 }
 0x619   :  { %v1029_v57 = vadd.f32 %v1743_v37, %v1028_v56 }
 0x61b   :  { %v1036_v58 = vmul.f32 0.9048374, %v1029_v57  ;;  %1031 = vrot.lane.b32.xlu1 %v1029_v57, %s1498_s8 }
 0x61d   :  { %v1037_v60 = vadd.f32 %v1324_v48, %v1036_v58 }
 0x61f   :  { %v1038_v61 = vadd.f32 %v1743_v37, %v1037_v60 }
 0x621   :  { %1040 = vrot.lane.b32.xlu1 %v1038_v61, %s1502_s19  ;;  %v1045_v16 = vmul.f32 0.9048374, %v1038_v61 }
 0x66c   :  { %v785_v62 = vpop.permute.xlu0 %784 }
 0x66d   :  { %787 = vst.msk [vmem:[#allocation4 + $0x8] sm:$0xff] %vm432_vm6, %v785_v62 }
 0x670   :  { %v1416_v63 = vpop.permute.xlu0 %1415 }
 0x671   :  { %v1418_v0 = vunpack.i.h.bf16 %v1416_v63  ;;  %v1417_v1 = vunpack.i.l.bf16 %v1416_v63 }
 0x673   :  { %438 = vst.msk [vmem:[#allocation6] sm:$0xff] %vm432_vm6, %v1417_v1  ;;  %792 = vst.msk [vmem:[#allocation6 + $0x8] sm:$0xff] %vm432_vm6, %v1418_v0 }
 0x67b   :  { %v1005_v2 = vpop.permute.xlu0 %1004 }
 0x67c   :  { %1008 = vst.msk [vmem:[#allocation2] sm:$0xff] %vm1007_vm13, %v1005_v2 }
 0x681   :  { %v1014_v3 = vpop.permute.xlu0 %1013 }
 0x682   :  { %1017 = vst.msk [vmem:[#allocation2] sm:$0xff] %vm1016_vm14, %v1014_v3 }
 0x687   :  { %v1023_v4 = vpop.permute.xlu1 %1022 }
 0x688   :  { %1026 = vst.msk [vmem:[#allocation2] sm:$0xff] %vm1025_vm15, %v1023_v4 }
 0x68d   :  { %v1032_v5 = vpop.permute.xlu1 %1031 }
 0x68e   :  { %1035 = vst.msk [vmem:[#allocation2] sm:$0xff] %vm1034_vm1, %v1032_v5 }
 0x693   :  { %v1041_v6 = vpop.permute.xlu1 %1040 }
 0x694   :  { %1044 = vst.msk [vmem:[#allocation2] sm:$0xff] %vm1043_vm2, %v1041_v6 }
 0x6cf   :  { %v861_v7 = vpop.f32.mrb[12].mxu1 }
 0x6d0   :  { %v869_v8 = vadd.f32 %v868_v41, %v861_v7  ;;  %v1307_v9 = vpop.f32.mrb[13].mxu1 }
 0x6d2   :  { %vm870_vm3 = vcmp.gt.f32.partialorder %v869_v8, 1.0  ;;  %874 = vrot.lane.b32.xlu0 %v869_v8, %s1499_s9 }
 0x6d3   :  { %v1126_v10 = vsel %vm870_vm3, 1.0, %v1496_v19 }
 0x6d4   :  { %1326 = vmatmul.mubr.msk.f32.gmra.mrb[16].mxu0 %vm37_vm0, %v1126_v10  ;;  %v1419_v12 = vpack.i.bf16 %v1126_v10, %v1681_v59 }
 0x6d6   :  { %1420 = vrot.lane.b32.xlu0 %v1419_v12, %s1499_s9 }
 0x744   :  { %v875_v11 = vpop.permute.xlu0 %874 }
 0x745   :  { %877 = vst.msk [vmem:[#allocation4 + $0x8] sm:$0xff] %vm523_vm8, %v875_v11 }
 0x748   :  { %v1421_v14 = vpop.permute.xlu0 %1420 }
 0x749   :  { %v1423_v13 = vunpack.i.h.bf16 %v1421_v14  ;;  %v1422_v15 = vunpack.i.l.bf16 %v1421_v14 }
 0x74b   :  { %529 = vst.msk [vmem:[#allocation6] sm:$0xff] %vm523_vm8, %v1422_v15  ;;  %882 = vst.msk [vmem:[#allocation6 + $0x8] sm:$0xff] %vm523_vm8, %v1423_v13 }
 0x7a7   :  { %v1327_v19 = vpop.f32.mrb[16].mxu0 }
 0x7a8   :  { %1435 = shalt.err (!%p1432_p4)
}
 0x7a9   :  { %s1436_s25 = scalar_lea.hbm %s1810_s6, 256 }
 0x7aa   :  { %p1437_p5 = scmp.ne.s32.totalorder %s1810_s6, %s1436_s25  ;;  %p1440_p6 = scmp.lt.u32.totalorder %s1436_s25, %s1810_s6 }
 0x7ac   :  { %p1442_p7 = pnand %p1440_p6, %p1437_p5 }
 0x7ae   :  { %1445 = shalt.err (!%p1442_p7)
}
 0x7af   :  { %1082 = dma.vmem_to_hbm [thread:$0]  %s1080_s21, 256, %s1810_s6, [#allocation5]   ;;  %v981_v59 = vpop.f32.mrb[17].mxu0 }
 0x7b0   :  { %v1046_v17 = vadd.f32 %v1045_v16, %v981_v59  ;;  %s1504_s0 = smov [#allocation6]  }
 0x7b1   :  { %s1089_s8 = sshll.u32 %s1504_s0, 4  ;;  %s1090_s8 = int_to_ptr.vmem [resolvable:$true] %s1089_s8 }
 0x7b2   :  { %v1047_v18 = vadd.f32 %v1743_v37, %v1046_v17  ;;  %s1446_s10 = scalar_lea.vmem %s1090_s8, 256  ;;  %p1451_p9 = scmp.lt.s32.totalorder %s1090_s8, %s1090_s8 }
 0x7b3   :  { %p1447_p8 = scmp.ne.s32.totalorder %s1090_s8, %s1446_s10  ;;  %p1452_p10 = scmp.lt.s32.totalorder %s1446_s10, %s1446_s10 }
 0x7b5   :  { %p1453_p11 = por %p1452_p10, %p1451_p9 }
 0x7b7   :  { %p1454_p12 = pnand %p1453_p11, %p1447_p8 }
 0x7b9   :  { %1457 = shalt.err (!%p1454_p12)
}
 0x7ba   :  { %s1458_s13 = scalar_lea.hbm %s1811_s7, 256 }
 0x7bb   :  { %p1459_p13 = scmp.ne.s32.totalorder %s1811_s7, %s1458_s13  ;;  %p1462_p0 = scmp.lt.u32.totalorder %s1458_s13, %s1811_s7 }
 0x7bd   :  { %p1464_p1 = pnand %p1462_p0, %p1459_p13 }
 0x7bf   :  { %1467 = shalt.err (!%p1464_p1)
}
 0x7c0   :  { %1092 = dma.vmem_to_hbm [thread:$0]  %s1090_s8, 256, %s1811_s7, [#allocation5]   ;;  %v1054_v20 = vmul.f32 0.9048374, %v1047_v18  ;;  %1049 = vrot.lane.b32.xlu1 %v1047_v18, %s1499_s9  ;;  %vm1052_vm0 = vcmask 917248   ;;  %vm1061_vm4 = vcmask 1048448  }
 0x7c1   :  { %s1505_s17 = smov 112   ;;  %s1506_s4 = smov [#allocation2]  }
 0x7c2   :  { %v1055_v21 = vadd.f32 %v1327_v19, %v1054_v20  ;;  %s1069_s18 = sshll.u32 %s1506_s4, 4  ;;  %s1070_s18 = int_to_ptr.vmem [resolvable:$true] %s1069_s18 }
 0x7c3   :  { %s1468_s19 = scalar_lea.vmem %s1070_s18, 128  ;;  %p1473_p3 = scmp.lt.s32.totalorder %s1070_s18, %s1070_s18 }
 0x7c4   :  { %v1056_v22 = vadd.f32 %v1743_v37, %v1055_v21  ;;  %p1469_p2 = scmp.ne.s32.totalorder %s1070_s18, %s1468_s19  ;;  %p1474_p4 = scmp.lt.s32.totalorder %s1468_s19, %s1468_s19 }
 0x7c6   :  { %1058 = vrot.lane.b32.xlu1 %v1056_v22, %s1505_s17  ;;  %p1475_p5 = por %p1474_p4, %p1473_p3 }
 0x7c8   :  { %p1476_p6 = pnand %p1475_p5, %p1469_p2 }
 0x832   :  { %v1050_v23 = vpop.permute.xlu1 %1049 }
 0x833   :  { %1053 = vst.msk [vmem:[#allocation2] sm:$0xff] %vm1052_vm0, %v1050_v23 }
 0x838   :  { %v1059_v24 = vpop.permute.xlu1 %1058 }
 0x839   :  { %1062 = vst.msk [vmem:[#allocation2] sm:$0xff] %vm1061_vm4, %v1059_v24 }
 0x83a   :  { %1479 = shalt.err (!%p1476_p6)
}
 0x83b   :  { %s1480_s20 = scalar_lea.hbm %s1809_s5, 128 }
 0x83c   :  { %p1481_p7 = scmp.ne.s32.totalorder %s1809_s5, %s1480_s20  ;;  %p1484_p8 = scmp.lt.u32.totalorder %s1480_s20, %s1809_s5 }
 0x83e   :  { %p1486_p9 = pnand %p1484_p8, %p1481_p7 }
 0x840   :  { %1489 = shalt.err (!%p1486_p9)
}
 0x841   :  { %1072 = dma.vmem_to_hbm [thread:$0]  %s1070_s18, 128, %s1809_s5, [#allocation3]  }
 0x842   :  { %1490 = dma.done.wait [#allocation3], 128  }
 0x843   :  { %1491 = vsyncadd [#allocation3], 4294967168 }
 0x844   :  { %1492 = dma.done.wait [#allocation5], 512  }
 0x845   :  { %1493 = vsyncadd [#allocation5], 4294966784 }
 0x846   :  { %1102 = vsyncpa [#allocation3], 1 }
 0x847   :  { %1103 = vsyncpa [#allocation5], 1 }

</bundles_post_ra>
